<compile_context>
chip_gen: v7x
topology: tpu7x:2x2x1
jax: 0.10.0
libtpu: 0.0.40
codegen_flags: <defaults>
</compile_context>

<pallas_src>
import numpy as np
import jax
import jax.numpy as jnp
from jax.experimental import pallas as pl
from jax.experimental.pallas import tpu as pltpu

# ----- module hyper-parameters (small, consistent with the forward) -----
IMG_SIZE = 16
PATCH_SIZE = 4
IN_CHANNELS = 4
EMB_SIZE = 32
BATCH = 2

GRID = IMG_SIZE // PATCH_SIZE                 # patches per side
N_PATCHES = GRID * GRID                       # = conv out_channels = 16
K = IN_CHANNELS * PATCH_SIZE * PATCH_SIZE     # flattened patch length = 64
SEQ = N_PATCHES + 1                           # cls + patches = 17


def _round_up(n, m):
    return ((n + m - 1) // m) * m


# Packed constant-buffer layout: one DMA stream for everything weight-derived.
# Row offsets are 8-aligned so in-kernel static slices stay sublane-aligned.
WC_ROW = 0                                      # rows [0, SEQ):        (SEQ, K)   zero-padded conv weight
WL_ROW = _round_up(WC_ROW + SEQ, 8)             # rows [24, 24+NP):     (NP, EMB)  linear weight^T
CONST_ROW = _round_up(WL_ROW + N_PATCHES, 8)    # rows [40, 40+SEQ):    (SEQ, EMB) cls row + folded pos/biases
CBUF_ROWS = _round_up(CONST_ROW + SEQ, 8)       # 64
CBUF_COLS = K                                   # 64


def positional_encoding(sequence_len, output_dim, n=10000.0):
    # Faithful port of the reference PositionalEncoding (including the shared
    # sin/cos argument k / n**(2*i/dim)).
    P = np.zeros((sequence_len, output_dim), dtype=np.float32)
    for k in range(sequence_len):
        for i in range(0, output_dim, 2):
            denom = np.power(n, 2.0 * i / output_dim)
            P[k, i] = np.sin(k / denom)
            P[k, i + 1] = np.cos(k / denom)
    return jnp.asarray(P)


def patchify_kcn(x):
    # (B, C, H, W) -> (B, K, NP); K flattening order (c, ki, kj) matches the
    # Conv2d weight layout, NP is row-major over (H', W').
    B, C, H, W = x.shape
    G = H // PATCH_SIZE
    x = x.reshape(B, C, G, PATCH_SIZE, G, PATCH_SIZE)   # (b, c, gi, ki, gj, kj)
    x = x.transpose(0, 1, 3, 5, 2, 4)                   # (b, c, ki, kj, gi, gj)
    return x.reshape(B, K, N_PATCHES).astype(jnp.float32)


# -------------------- one-time (init-time) constant folding --------------------
def prepare_patch_embed_constants(w_conv, b_conv, w_lin, b_lin, cls_token, pos):
    """Fold every weight-derived / additive constant into ONE packed buffer.

    buf[0:SEQ,        0:K  ] = [zeros(1,K); w_conv.reshape(NP,K)]   (SEQ, K)
    buf[WL_ROW:+NP,   0:EMB] = w_lin.T                              (NP, EMB)
    buf[CONST_ROW:+SEQ,0:EMB] = [cls; pos + b_lin + outer(b_conv, colsum(w_lin.T))]
    """
    wc2 = w_conv.reshape(N_PATCHES, K).astype(jnp.float32)                 # (NP, K)
    wc_pad = jnp.concatenate([jnp.zeros((1, K), jnp.float32), wc2], axis=0)  # (SEQ, K), row0=0

    wl_t = w_lin.T.astype(jnp.float32)                                     # (NP, EMB)
    body = (pos.astype(jnp.float32)
            + b_lin.astype(jnp.float32)[None, :]
            + jnp.outer(b_conv.astype(jnp.float32), jnp.sum(wl_t, axis=0)))  # (NP, EMB)
    const_pad = jnp.concatenate(
        [cls_token.reshape(1, EMB_SIZE).astype(jnp.float32), body], axis=0)  # (SEQ, EMB)

    buf = jnp.zeros((CBUF_ROWS, CBUF_COLS), jnp.float32)
    buf = buf.at[WC_ROW:WC_ROW + SEQ, 0:K].set(wc_pad)
    buf = buf.at[WL_ROW:WL_ROW + N_PATCHES, 0:EMB_SIZE].set(wl_t)
    buf = buf.at[CONST_ROW:CONST_ROW + SEQ, 0:EMB_SIZE].set(const_pad)
    return buf


# ------------------------------ Pallas kernel ------------------------------
def patch_embed_kernel(p_ref, cbuf_ref, o_ref):
    # p_ref   : (nb, K, NP)           patches, k-major  (nb = B gridless, 1 gridded)
    # cbuf_ref: (CBUF_ROWS, CBUF_COLS) packed constants
    # o_ref   : (nb, SEQ, EMB)        final output (cls row included)
    wc_pad = cbuf_ref[WC_ROW:WC_ROW + SEQ, 0:K]                    # (SEQ, K),  row0 = 0
    wl_t = cbuf_ref[WL_ROW:WL_ROW + N_PATCHES, 0:EMB_SIZE]         # (NP, EMB)
    const = cbuf_ref[CONST_ROW:CONST_ROW + SEQ, 0:EMB_SIZE]        # (SEQ, EMB), row0 = cls

    nb = p_ref.shape[0]          # static
    for b in range(nb):          # static unroll (tiny batch)
        # Conv2d(stride=patch): (SEQ, K) @ (K, NP) — standard last-dim contraction.
        conv_t = jnp.dot(wc_pad, p_ref[b],
                         preferred_element_type=jnp.float32)       # (SEQ, NP), row0 = 0
        # Linear over the spatial axis: (SEQ, NP) @ (NP, EMB).
        lin = jnp.dot(conv_t, wl_t,
                      preferred_element_type=jnp.float32)          # (SEQ, EMB)
        # One aligned 17-row store: cls (row 0) + pos + biases all in `const`.
        o_ref[b] = lin + const


def _two_tensorcore_chip():
    # v7x has 2 TensorCores per chip -> shard the batch grid across them.
    try:
        kind = jax.devices()[0].device_kind.lower()
    except Exception:
        return False
    return ("v7" in kind) or ("tpu7" in kind)


BATCH_PARALLEL_GRID = _two_tensorcore_chip()


def _build_call(batch):
    flops = batch * (2 * SEQ * K * N_PATCHES + 2 * SEQ * N_PATCHES * EMB_SIZE)
    bytes_accessed = 4 * (batch * K * N_PATCHES
                          + CBUF_ROWS * CBUF_COLS
                          + batch * SEQ * EMB_SIZE)
    cost = pl.CostEstimate(flops=flops, transcendentals=0,
                           bytes_accessed=bytes_accessed)
    out_shape = jax.ShapeDtypeStruct((batch, SEQ, EMB_SIZE), jnp.float32)

    if BATCH_PARALLEL_GRID and batch > 1:
        # v7x: one batch element per grid step, "parallel" -> split across TCs.
        return pl.pallas_call(
            patch_embed_kernel,
            out_shape=out_shape,
            grid=(batch,),
            in_specs=[pl.BlockSpec((1, K, N_PATCHES), lambda b: (b, 0, 0)),
                      pl.BlockSpec((CBUF_ROWS, CBUF_COLS), lambda b: (0, 0))],
            out_specs=pl.BlockSpec((1, SEQ, EMB_SIZE), lambda b: (b, 0, 0)),
            compiler_params=pltpu.CompilerParams(
                dimension_semantics=("parallel",),
                allow_input_fusion=[True, False]),
            cost_estimate=cost,
        )

    # v5e/v6e (single TC): gridless — whole problem (~25 KB) resident in VMEM,
    # one kernel invocation, zero per-step pipeline overhead.
    return pl.pallas_call(
        patch_embed_kernel,
        out_shape=out_shape,
        compiler_params=pltpu.CompilerParams(
            allow_input_fusion=[True, False]),
        cost_estimate=cost,
    )


@jax.jit
def patch_embedding_forward(x, const_buf):
    # Per-call path: patchify (fused by XLA, candidate for input fusion into
    # the Pallas operand) + a single pallas_call.  All weight prep lives in
    # prepare_patch_embed_constants(), done once at init.
    patches = patchify_kcn(x)                                      # (B, K, NP)
    return _build_call(x.shape[0])(patches, const_buf)             # (B, SEQ, EMB)


# ---------------------------- pure-JAX reference ----------------------------
def reference_forward(x, w_conv, b_conv, w_lin, b_lin, cls_token, pos):
    B, C, H, W = x.shape
    G = H // PATCH_SIZE
    xr = x.reshape(B, C, G, PATCH_SIZE, G, PATCH_SIZE)
    xr = xr.transpose(0, 2, 4, 1, 3, 5).reshape(B, N_PATCHES, K)   # (B, s, k)
    conv = xr @ w_conv.reshape(N_PATCHES, K).T + b_conv            # (B, s, o)
    conv = jnp.transpose(conv, (0, 2, 1))                          # (B, o, s) == Flatten(Conv2d)
    lin = conv @ w_lin.T + b_lin                                   # (B, o, EMB)
    y = lin + pos[None]
    cls = jnp.broadcast_to(cls_token.reshape(1, 1, EMB_SIZE), (B, 1, EMB_SIZE))
    return jnp.concatenate([cls, y], axis=1)


if __name__ == "__main__":
    key = jax.random.PRNGKey(0)
    k_x, k_wc, k_bc, k_wl, k_bl, k_cls = jax.random.split(key, 6)

    x = jax.random.normal(k_x, (BATCH, IN_CHANNELS, IMG_SIZE, IMG_SIZE),
                          dtype=jnp.float32)

    # Deterministic parameter init (shapes from the module's __init__).
    w_conv = jax.random.normal(
        k_wc, (N_PATCHES, IN_CHANNELS, PATCH_SIZE, PATCH_SIZE),
        dtype=jnp.float32) * 0.1
    b_conv = jax.random.normal(k_bc, (N_PATCHES,), dtype=jnp.float32) * 0.1
    w_lin = jax.random.normal(k_wl, (EMB_SIZE, N_PATCHES),
                              dtype=jnp.float32) * 0.1
    b_lin = jax.random.normal(k_bl, (EMB_SIZE,), dtype=jnp.float32) * 0.1
    # Module initializes cls_token to zeros; use non-zero values here so the
    # folded cls-row path is actually exercised (per review).
    cls_token = jax.random.normal(k_cls, (1, 1, EMB_SIZE),
                                  dtype=jnp.float32) * 0.1
    pos = positional_encoding(N_PATCHES, EMB_SIZE)

    # One-time init-path prep (not part of the per-call forward).
    const_buf = jax.block_until_ready(
        prepare_patch_embed_constants(w_conv, b_conv, w_lin, b_lin,
                                      cls_token, pos))

    out = patch_embedding_forward(x, const_buf)
    out = jax.block_until_ready(out)

    ref = reference_forward(x, w_conv, b_conv, w_lin, b_lin, cls_token, pos)
    assert out.shape == (BATCH, N_PATCHES + 1, EMB_SIZE), out.shape
    np.testing.assert_allclose(np.asarray(out), np.asarray(ref),
                               rtol=1e-5, atol=1e-5)
    print("KERNEL_OK")
</pallas_src>

<mosaic_0001>
module attributes {stable_mosaic.version = 11 : i64} {
  func.func @patch_embed_kernel(%arg0: memref<2x64x16xf32, #tpu.memory_space<vmem>>, %arg1: memref<64x64xf32, #tpu.memory_space<vmem>>, %arg2: memref<2x17x32xf32, #tpu.memory_space<vmem>>) attributes {dimension_semantics = [], scalar_prefetch = 0 : i64, scratch_operands = 0 : i64, tpu.core_type = #tpu.core_type<tc>} {
    %c0 = arith.constant 0 : index
    %c0_0 = arith.constant 0 : index
    %0 = vector.load %arg1[%c0, %c0_0] : memref<64x64xf32, #tpu.memory_space<vmem>>, vector<17x64xf32>
    %c24 = arith.constant 24 : index
    %c0_1 = arith.constant 0 : index
    %1 = vector.load %arg1[%c24, %c0_1] : memref<64x64xf32, #tpu.memory_space<vmem>>, vector<16x32xf32>
    %c40 = arith.constant 40 : index
    %c0_2 = arith.constant 0 : index
    %2 = vector.load %arg1[%c40, %c0_2] : memref<64x64xf32, #tpu.memory_space<vmem>>, vector<17x32xf32>
    %c0_3 = arith.constant 0 : index
    %c0_4 = arith.constant 0 : index
    %c0_5 = arith.constant 0 : index
    %3 = vector.load %arg0[%c0_3, %c0_4, %c0_5] : memref<2x64x16xf32, #tpu.memory_space<vmem>>, vector<1x64x16xf32>
    %4 = vector.shape_cast %3 : vector<1x64x16xf32> to vector<64x16xf32>
    %cst = arith.constant dense<0.000000e+00> : vector<17x16xf32>
    %5 = tpu.matmul %0, %4, %cst {dimension_numbers = #tpu.dot_dimension_numbers<[1], [0], [0], [1], [0, 0, 1, 1], [], []>} : vector<17x64xf32>, vector<64x16xf32>, vector<17x16xf32> -> vector<17x16xf32>
    %cst_6 = arith.constant dense<0.000000e+00> : vector<17x32xf32>
    %6 = tpu.matmul %5, %1, %cst_6 {dimension_numbers = #tpu.dot_dimension_numbers<[1], [0], [0], [1], [0, 0, 1, 1], [], []>} : vector<17x16xf32>, vector<16x32xf32>, vector<17x32xf32> -> vector<17x32xf32>
    %7 = arith.addf %6, %2 : vector<17x32xf32>
    %c0_7 = arith.constant 0 : index
    %c0_8 = arith.constant 0 : index
    %c0_9 = arith.constant 0 : index
    %8 = vector.load %arg2[%c0_7, %c0_8, %c0_9] : memref<2x17x32xf32, #tpu.memory_space<vmem>>, vector<1x17x32xf32>
    %9 = vector.shape_cast %8 : vector<1x17x32xf32> to vector<17x32xf32>
    %10 = vector.shape_cast %7 : vector<17x32xf32> to vector<1x17x32xf32>
    tpu.vector_store %arg2[%c0_7, %c0_8, %c0_9], %10 {strides = array<i32>} : memref<2x17x32xf32, #tpu.memory_space<vmem>>, vector<1x17x32xf32>,
    %c1 = arith.constant 1 : index
    %c0_10 = arith.constant 0 : index
    %c0_11 = arith.constant 0 : index
    %11 = vector.load %arg0[%c1, %c0_10, %c0_11] : memref<2x64x16xf32, #tpu.memory_space<vmem>>, vector<1x64x16xf32>
    %12 = vector.shape_cast %11 : vector<1x64x16xf32> to vector<64x16xf32>
    %cst_12 = arith.constant dense<0.000000e+00> : vector<17x16xf32>
    %13 = tpu.matmul %0, %12, %cst_12 {dimension_numbers = #tpu.dot_dimension_numbers<[1], [0], [0], [1], [0, 0, 1, 1], [], []>} : vector<17x64xf32>, vector<64x16xf32>, vector<17x16xf32> -> vector<17x16xf32>
    %cst_13 = arith.constant dense<0.000000e+00> : vector<17x32xf32>
    %14 = tpu.matmul %13, %1, %cst_13 {dimension_numbers = #tpu.dot_dimension_numbers<[1], [0], [0], [1], [0, 0, 1, 1], [], []>} : vector<17x16xf32>, vector<16x32xf32>, vector<17x32xf32> -> vector<17x32xf32>
    %15 = arith.addf %14, %2 : vector<17x32xf32>
    %c1_14 = arith.constant 1 : index
    %c0_15 = arith.constant 0 : index
    %c0_16 = arith.constant 0 : index
    %16 = vector.load %arg2[%c1_14, %c0_15, %c0_16] : memref<2x17x32xf32, #tpu.memory_space<vmem>>, vector<1x17x32xf32>
    %17 = vector.shape_cast %16 : vector<1x17x32xf32> to vector<17x32xf32>
    %18 = vector.shape_cast %15 : vector<17x32xf32> to vector<1x17x32xf32>
    tpu.vector_store %arg2[%c1_14, %c0_15, %c0_16], %18 {strides = array<i32>} : memref<2x17x32xf32, #tpu.memory_space<vmem>>, vector<1x17x32xf32>,
    return
  }
}

</mosaic_0001>

<bundles_post_ra>
// kernel: patch_embedding_forward.1
= control target key start
LH: loop header
LB: loop body
LE: loop exit
PB: predicated region body
PF: predicated region fallthrough
CT: control target
= control target key end

     0   :  { %v564_v0 = vmov 0.0|0.0   ;;  %vm565_vm0 = vmmov 0   ;;  %v566_v4 = vmov 0.0   ;;  %vm27_vm1 = vcmask 523264   ;;  %s725_s0 = inlined_call_operand.vmem [shape: f32[2,64,16], index: 0, kind: input, shape index: {}]   ;;  %s726_s1 = inlined_call_operand.vmem [shape: f32[64,64], index: 1, kind: input, shape index: {}]   ;;  %s727_s2 = inlined_call_operand.vmem [shape: f32[2,17,32], index: 2, kind: output, shape index: {}]  }
   0x1   :  { %529 = vmatprep.subr.bf16.mxu0 %v564_v0  ;;  %v19_v1 = vld [vmem:[%s725_s0] sm:$0xff]  ;;  %v20_v2 = vld [vmem:[%s725_s0 + $0x8] sm:$0xff]  ;;  %v21_v3 = vld [vmem:[%s725_s0 + $0x10] sm:$0xff]  ;;  %469 = vmatprep.mubr.msk.f32.mxu0 %vm565_vm0, %v566_v4  ;;  %vm117_vm2 = vcmask 130048   ;;  %vm207_vm3 = vcmask 261120   ;;  %vm210_vm4 = vcmask 253952  }
   0x2   :  { %v530_v5 = vpack.c.bf16 %v20_v2, %v19_v1  ;;  %v22_v6 = vld [vmem:[%s725_s0 + $0x18] sm:$0xff]  ;;  %541 = vmatprep.subr.bf16.mxu1 %v564_v0  ;;  %482 = vmatprep.mubr.msk.f32.mxu1 %vm565_vm0, %v566_v4  ;;  %v23_v9 = vld [vmem:[%s725_s0 + $0x20] sm:$0xff]  ;;  %v24_v10 = vld [vmem:[%s725_s0 + $0x28] sm:$0xff] }
   0x3   :  { %v533_v7 = vpack.c.bf16 %v22_v6, %v21_v3  ;;  %v14_v8 = vld [vmem:[%s726_s1 + $0x18] sm:$0xff]  ;;  %v15_v11 = vld [vmem:[%s726_s1 + $0x20] sm:$0xff]  ;;  %v536_v13 = vpack.c.bf16 %v24_v10, %v23_v9  ;;  %v25_v14 = vld [vmem:[%s725_s0 + $0x30] sm:$0xff] }
   0x4   :  { %531 = vmatpush3.bf16.msra.mxu0 %v530_v5  ;;  %v542_v12 = vpack.c.bf16 %v15_v11, %v14_v8  ;;  %v26_v15 = vld [vmem:[%s725_s0 + $0x38] sm:$0xff]  ;;  %v11_v17 = vld [vmem:[%s726_s1] sm:$0xff]  ;;  %v12_v18 = vld [vmem:[%s726_s1 + $0x8] sm:$0xff] }
   0x5   :  { %532 = vmatprep.subr.bf16.mxu0 %v564_v0  ;;  %v539_v16 = vpack.c.bf16 %v26_v15, %v25_v14  ;;  %v13_v19 = vld [vmem:[%s726_s1 + $0x10] sm:$0x1]  ;;  %v404_v20 = vld [vmem:[%s725_s0 + $0x40] sm:$0xff]  ;;  %v405_v21 = vld [vmem:[%s725_s0 + $0x48] sm:$0xff] }
   0x6   :  { %543 = vmatpush3.bf16.msra.mxu1 %v542_v12  ;;  %v545_v22 = vpack.c.bf16 %v405_v21, %v404_v20  ;;  %v406_v23 = vld [vmem:[%s725_s0 + $0x50] sm:$0xff]  ;;  %v407_v24 = vld [vmem:[%s725_s0 + $0x58] sm:$0xff]  ;;  %v408_v28 = vld [vmem:[%s725_s0 + $0x60] sm:$0xff] }
   0x7   :  { %544 = vmatprep.subr.bf16.mxu1 %v564_v0  ;;  %v548_v27 = vpack.c.bf16 %v407_v24, %v406_v23  ;;  %v409_v29 = vld [vmem:[%s725_s0 + $0x68] sm:$0xff]  ;;  %v410_v33 = vld [vmem:[%s725_s0 + $0x70] sm:$0xff]  ;;  %v411_v34 = vld [vmem:[%s725_s0 + $0x78] sm:$0xff] }
   0x8   :  { %534 = vmatpush3.bf16.msra.mxu0 %v533_v7  ;;  %v551_v32 = vpack.c.bf16 %v409_v29, %v408_v28  ;;  %v554_v37 = vpack.c.bf16 %v411_v34, %v410_v33  ;;  %v16_v38 = vld [vmem:[%s726_s1 + $0x28] sm:$0xff]  ;;  %v17_v42 = vld [vmem:[%s726_s1 + $0x30] sm:$0xff]  ;;  %v18_v46 = vld [vmem:[%s726_s1 + $0x38] sm:$0x1] }
   0x9   :  { %535 = vmatprep.subr.bf16.mxu0 %v564_v0 }
   0xc   :  { %537 = vmatpush3.bf16.msra.mxu0 %v536_v13 }
   0xd   :  { %538 = vmatprep.subr.bf16.mxu0 %v564_v0 }
  0x10   :  { %540 = vmatpush3.bf16.msra.mxu0 %v539_v16 }
  0x11   :  { %556 = vmatprep.subr.bf16.mxu0 %v564_v0 }
  0x13   :  { %470 = vmatmul.mubr.msk.f32.vlgmr.msra.gmra.mrb[0].mxu0 %vm27_vm1, %v11_v17 }
  0x14   :  { %472 = vmatprep.mubr.msk.f32.mxu0 %vm565_vm0, %v566_v4  ;;  %558 = vmatpush3.bf16.msra.mxu0 %v542_v12 }
  0x17   :  { %473 = vmatmul.mubr.msk.f32.gmra.mrb[2].mxu0 %vm27_vm1, %v12_v18 }
  0x18   :  { %475 = vmatprep.mubr.msk.f32.mxu0 %vm565_vm0, %v566_v4 }
  0x1b   :  { %476 = vmatmul.mubr.msk.f32.gmra.mrb[4].mxu0 %vm27_vm1, %v13_v19 }
  0x1c   :  { %520 = vmatprep.mubr.msk.f32.mxu0 %vm565_vm0, %v566_v4 }
  0xe6   :  { %v103_v25 = vpop.f32.mrb[0].mxu0 }
  0xe7   :  { %v471_v26 = vpop.f32.mrb[1].mxu0  ;;  %483 = vmatmul.mubr.msk.f32.vlgmr.msra.gmra.mrb[0].mxu1 %vm117_vm2, %v103_v25 }
  0xe8   :  { %546 = vmatpush3.bf16.msra.mxu1 %v545_v22  ;;  %485 = vmatprep.mubr.msk.f32.mxu1 %vm565_vm0, %v566_v4 }
  0xe9   :  { %547 = vmatprep.subr.bf16.mxu1 %v564_v0 }
  0xea   :  { %v108_v30 = vpop.f32.mrb[2].mxu0 }
  0xeb   :  { %v474_v31 = vpop.f32.mrb[3].mxu0  ;;  %486 = vmatmul.mubr.msk.f32.gmra.mrb[2].mxu1 %vm117_vm2, %v108_v30 }
  0xec   :  { %549 = vmatpush3.bf16.msra.mxu1 %v548_v27  ;;  %488 = vmatprep.mubr.msk.f32.mxu1 %vm565_vm0, %v566_v4 }
  0xed   :  { %550 = vmatprep.subr.bf16.mxu1 %v564_v0 }
  0xee   :  { %v113_v35 = vpop.f32.mrb[4].mxu0 }
  0xef   :  { %v477_v36 = vpop.f32.mrb[5].mxu0  ;;  %489 = vmatmul.mubr.msk.f32.gmra.mrb[4].mxu1 %vm117_vm2, %v113_v35 }
  0xf0   :  { %552 = vmatpush3.bf16.msra.mxu1 %v551_v32  ;;  %507 = vmatprep.mubr.msk.f32.mxu1 %vm565_vm0, %v566_v4 }
  0xf1   :  { %553 = vmatprep.subr.bf16.mxu1 %v564_v0 }
  0xf4   :  { %555 = vmatpush3.bf16.msra.mxu1 %v554_v37 }
  0xf5   :  { %559 = vmatprep.subr.bf16.mxu1 %v564_v0 }
  0xf7   :  { %508 = vmatmul.mubr.msk.f32.vlgmr.msra.gmra.mrb[6].mxu1 %vm27_vm1, %v11_v17 }
  0xf8   :  { %510 = vmatprep.mubr.msk.f32.mxu1 %vm565_vm0, %v566_v4  ;;  %560 = vmatpush3.bf16.msra.mxu1 %v542_v12 }
  0xfb   :  { %511 = vmatmul.mubr.msk.f32.gmra.mrb[8].mxu1 %vm27_vm1, %v12_v18 }
  0xfc   :  { %513 = vmatprep.mubr.msk.f32.mxu1 %vm565_vm0, %v566_v4 }
  0xff   :  { %514 = vmatmul.mubr.msk.f32.gmra.mrb[10].mxu1 %vm27_vm1, %v13_v19 }
 0x100   :  { %526 = vmatprep.mubr.msk.f32.mxu1 %vm565_vm0, %v566_v4 }
 0x1ba   :  { %v193_v39 = vpop.f32.mrb[0].mxu1 }
 0x1bb   :  { %v194_v40 = vadd.f32 %v193_v39, %v16_v38  ;;  %v484_v41 = vpop.f32.mrb[1].mxu1 }
 0x1bd   :  { %208 = vst.msk [vmem:[%s727_s2] sm:$0xff] %vm207_vm3, %v194_v40 }
 0x1be   :  { %v198_v43 = vpop.f32.mrb[2].mxu1 }
 0x1bf   :  { %v199_v44 = vadd.f32 %v198_v43, %v17_v42  ;;  %v487_v45 = vpop.f32.mrb[3].mxu1 }
 0x1c1   :  { %209 = vst.msk [vmem:[%s727_s2 + $0x8] sm:$0xff] %vm207_vm3, %v199_v44 }
 0x1c2   :  { %v203_v47 = vpop.f32.mrb[4].mxu1 }
 0x1c3   :  { %v204_v48 = vadd.f32 %v203_v47, %v18_v46  ;;  %v490_v49 = vpop.f32.mrb[5].mxu1 }
 0x1c5   :  { %211 = vst.msk [vmem:[%s727_s2 + $0x10] sm:$0x1] %vm210_vm4, %v204_v48 }
 0x1ca   :  { %v287_v50 = vpop.f32.mrb[6].mxu1 }
 0x1cb   :  { %v509_v51 = vpop.f32.mrb[7].mxu1  ;;  %521 = vmatmul.mubr.msk.f32.vlgmr.msra.gmra.mrb[6].mxu0 %vm117_vm2, %v287_v50 }
 0x1cc   :  { %523 = vmatprep.mubr.msk.f32.mxu0 %vm565_vm0, %v566_v4 }
 0x1ce   :  { %v292_v52 = vpop.f32.mrb[8].mxu1 }
 0x1cf   :  { %v512_v53 = vpop.f32.mrb[9].mxu1  ;;  %524 = vmatmul.mubr.msk.f32.gmra.mrb[8].mxu0 %vm117_vm2, %v292_v52 }
 0x1d2   :  { %v297_v54 = vpop.f32.mrb[10].mxu1 }
 0x1d3   :  { %v515_v55 = vpop.f32.mrb[11].mxu1  ;;  %527 = vmatmul.mubr.msk.f32.vlgmr.msra.gmra.mrb[12].mxu1 %vm117_vm2, %v297_v54 }
 0x29e   :  { %v376_v56 = vpop.f32.mrb[6].mxu0 }
 0x29f   :  { %v377_v57 = vadd.f32 %v376_v56, %v16_v38  ;;  %v522_v58 = vpop.f32.mrb[7].mxu0 }
 0x2a1   :  { %418 = vst.msk [vmem:[%s727_s2 + $0x18] sm:$0xff] %vm207_vm3, %v377_v57 }
 0x2a2   :  { %v381_v59 = vpop.f32.mrb[8].mxu0 }
 0x2a3   :  { %v382_v60 = vadd.f32 %v381_v59, %v17_v42  ;;  %v525_v61 = vpop.f32.mrb[9].mxu0 }
 0x2a5   :  { %419 = vst.msk [vmem:[%s727_s2 + $0x20] sm:$0xff] %vm207_vm3, %v382_v60 }
 0x2a6   :  { %v386_v62 = vpop.f32.mrb[12].mxu1 }
 0x2a7   :  { %v387_v63 = vadd.f32 %v386_v62, %v18_v46  ;;  %v528_v0 = vpop.f32.mrb[13].mxu1 }
 0x2a9   :  { %420 = vst.msk [vmem:[%s727_s2 + $0x28] sm:$0x1] %vm210_vm4, %v387_v63 }

</bundles_post_ra>
